<compile_context>
chip_gen: v6e
topology: v6e:2x2x1
jax: 0.10.0
libtpu: 0.0.40
codegen_flags: <defaults>
</compile_context>

<pallas_src>
import functools

import jax
import jax.numpy as jnp
from jax.experimental import pallas as pl
from jax.experimental.pallas import tpu as pltpu

INPUT_DIM = 50
HIDDEN_DIM = 20
OUTPUT_DIM = 5

DEFAULT_TILE_B = 8192          # rows of x per grid step
VMEM_LIMIT_BYTES = 48 << 20    # headroom for 8192-row tiles on all chips


def _round_down(n, m):
    return (n // m) * m


def mlp_kernel(x_ref, w1_ref, b1_ref, w2_ref, b2_ref, w3_ref, b3_ref, o_ref):
    # x arrives f32 (single HBM pass); cast the tile to bf16 in VMEM so every
    # matmul is a native bf16 MXU op with f32 accumulation.  Bias adds and
    # ReLUs stay f32.
    xb = x_ref[...].astype(jnp.bfloat16)
    h1 = jnp.dot(xb, w1_ref[...], preferred_element_type=jnp.float32)
    h1 = jnp.maximum(h1 + b1_ref[...], 0.0).astype(jnp.bfloat16)
    h2 = jnp.dot(h1, w2_ref[...], preferred_element_type=jnp.float32)
    h2 = jnp.maximum(h2 + b2_ref[...], 0.0).astype(jnp.bfloat16)
    y = jnp.dot(h2, w3_ref[...], preferred_element_type=jnp.float32) + b3_ref[...]
    o_ref[...] = y.astype(o_ref.dtype)


def _resident(shape):
    # Tiny weight/bias blocks: constant index_map -> VMEM-resident across grid.
    return pl.BlockSpec(shape, lambda i: (0,) * len(shape))


def _run_tiled(x_full, weights, tb, n_tiles):
    """Gridded call over the first n_tiles full (tb)-row tiles of x_full."""
    w1, b1, w2, b2, w3, b3 = weights
    rows = n_tiles * tb
    flops = 2 * rows * (INPUT_DIM * HIDDEN_DIM
                        + HIDDEN_DIM * HIDDEN_DIM
                        + HIDDEN_DIM * OUTPUT_DIM)
    bytes_accessed = rows * (INPUT_DIM + OUTPUT_DIM) * 4 + sum(
        int(w.size) * w.dtype.itemsize for w in weights)
    return pl.pallas_call(
        mlp_kernel,
        out_shape=jax.ShapeDtypeStruct((rows, OUTPUT_DIM), jnp.float32),
        grid_spec=pl.GridSpec(
            grid=(n_tiles,),
            in_specs=[
                pl.BlockSpec((tb, INPUT_DIM), lambda i: (i, 0)),  # streamed x
                _resident(w1.shape), _resident(b1.shape),
                _resident(w2.shape), _resident(b2.shape),
                _resident(w3.shape), _resident(b3.shape),
            ],
            out_specs=pl.BlockSpec((tb, OUTPUT_DIM), lambda i: (i, 0)),
        ),
        compiler_params=pltpu.CompilerParams(
            dimension_semantics=("parallel",),      # megacore shard on v7x
            vmem_limit_bytes=VMEM_LIMIT_BYTES,
        ),
        cost_estimate=pl.CostEstimate(
            flops=flops, transcendentals=0, bytes_accessed=bytes_accessed),
    )(x_full, w1, b1, w2, b2, w3, b3)


def _run_single(x_small, weights):
    """Single-block call for a <tile-sized slab (full-array blocks)."""
    w1, b1, w2, b2, w3, b3 = weights
    rows = x_small.shape[0]
    return pl.pallas_call(
        mlp_kernel,
        out_shape=jax.ShapeDtypeStruct((rows, OUTPUT_DIM), jnp.float32),
        grid_spec=pl.GridSpec(
            grid=(1,),
            in_specs=[
                pl.BlockSpec((rows, INPUT_DIM), lambda i: (0, 0)),
                _resident(w1.shape), _resident(b1.shape),
                _resident(w2.shape), _resident(b2.shape),
                _resident(w3.shape), _resident(b3.shape),
            ],
            out_specs=pl.BlockSpec((rows, OUTPUT_DIM), lambda i: (0, 0)),
        ),
        compiler_params=pltpu.CompilerParams(
            dimension_semantics=("arbitrary",),
            vmem_limit_bytes=VMEM_LIMIT_BYTES,
        ),
    )(x_small, w1, b1, w2, b2, w3, b3)


@functools.partial(jax.jit, static_argnames=("tile_b",))
def price_generator_forward(x, params, *, tile_b=DEFAULT_TILE_B):
    """Forward pass of PriceGenerator via fused Pallas kernels (one HBM pass over x)."""
    w1, b1, w2, b2, w3, b3 = params
    batch = x.shape[0]

    # Weights are tiny (few KB): cast once in the wrapper so the MXU sees
    # bf16 x bf16.  Biases stay f32.  x itself is NOT touched in the wrapper.
    weights = (w1.astype(jnp.bfloat16), b1,
               w2.astype(jnp.bfloat16), b2,
               w3.astype(jnp.bfloat16), b3)

    # Batch tile: multiple of 16 (bf16 sublane packing); capped so the
    # "parallel" grid keeps >=2 steps when the batch is large enough.
    tb = int(tile_b)
    if batch >= 32:
        tb = min(tb, _round_down(batch // 2, 16))
    tb = max(tb, 16)

    n_full = batch // tb
    rem = batch - n_full * tb

    parts = []
    if n_full > 0:
        parts.append(_run_tiled(x, weights, tb, n_full))
    if rem > 0:
        parts.append(_run_single(x[n_full * tb:], weights))
    return parts[0] if len(parts) == 1 else jnp.concatenate(parts, axis=0)


def init_params(key):
    """Deterministic init mimicking PyTorch nn.Linear (U[-1/sqrt(fan_in), +])."""
    def linear(k, fan_in, fan_out):
        kw, kb = jax.random.split(k)
        bound = 1.0 / jnp.sqrt(fan_in)
        # stored as (in, out) so kernel does x @ W
        w = jax.random.uniform(kw, (fan_in, fan_out), jnp.float32, -bound, bound)
        b = jax.random.uniform(kb, (1, fan_out), jnp.float32, -bound, bound)
        return w, b

    k1, k2, k3 = jax.random.split(key, 3)
    w1, b1 = linear(k1, INPUT_DIM, HIDDEN_DIM)
    w2, b2 = linear(k2, HIDDEN_DIM, HIDDEN_DIM)
    w3, b3 = linear(k3, HIDDEN_DIM, OUTPUT_DIM)
    return (w1, b1, w2, b2, w3, b3)


def reference_forward(x, params, *, match_kernel_dtypes=False):
    w1, b1, w2, b2, w3, b3 = params
    if match_kernel_dtypes:
        xb = x.astype(jnp.bfloat16)
        w1b, w2b, w3b = (w.astype(jnp.bfloat16) for w in (w1, w2, w3))
        h1 = jnp.maximum(jnp.dot(xb, w1b, preferred_element_type=jnp.float32) + b1, 0.0)
        h1 = h1.astype(jnp.bfloat16)
        h2 = jnp.maximum(jnp.dot(h1, w2b, preferred_element_type=jnp.float32) + b2, 0.0)
        h2 = h2.astype(jnp.bfloat16)
        return jnp.dot(h2, w3b, preferred_element_type=jnp.float32) + b3
    h1 = jnp.maximum(jnp.dot(x, w1) + b1, 0.0)
    h2 = jnp.maximum(jnp.dot(h1, w2) + b2, 0.0)
    return jnp.dot(h2, w3) + b3


if __name__ == "__main__":
    key = jax.random.PRNGKey(0)
    k_x1, k_x2, k_params = jax.random.split(key, 3)
    params = init_params(k_params)

    # Small demo batch: exercises the gridded (2-step, "parallel") main path.
    batch = 64
    x = jax.random.normal(k_x1, (batch, INPUT_DIM), jnp.float32)
    out = jax.block_until_ready(price_generator_forward(x, params))
    assert out.shape == (batch, OUTPUT_DIM), out.shape

    ref_match = reference_forward(x, params, match_kernel_dtypes=True)
    ref_f32 = reference_forward(x, params)
    assert jnp.allclose(out, ref_match, atol=1e-2, rtol=1e-2), "mismatch vs bf16-matched reference"
    assert jnp.allclose(out, ref_f32, atol=5e-2, rtol=5e-2), "mismatch vs f32 reference"

    # Larger ragged batch: exercises multi-tile grid + the <tile tail path (no pad of x).
    batch2 = 1000
    x2 = jax.random.normal(k_x2, (batch2, INPUT_DIM), jnp.float32)
    out2 = jax.block_until_ready(price_generator_forward(x2, params, tile_b=256))
    ref2 = reference_forward(x2, params, match_kernel_dtypes=True)
    assert out2.shape == (batch2, OUTPUT_DIM), out2.shape
    assert jnp.allclose(out2, ref2, atol=1e-2, rtol=1e-2), "mismatch vs reference (tiled+tail)"

    print("KERNEL_OK")
</pallas_src>

<mosaic_0001>
module attributes {stable_mosaic.version = 11 : i64} {
  func.func @mlp_kernel(%arg0: i32, %arg1: memref<32x50xf32, #tpu.memory_space<vmem>>, %arg2: memref<50x20xbf16, #tpu.memory_space<vmem>>, %arg3: memref<1x20xf32, #tpu.memory_space<vmem>>, %arg4: memref<20x20xbf16, #tpu.memory_space<vmem>>, %arg5: memref<1x20xf32, #tpu.memory_space<vmem>>, %arg6: memref<20x5xbf16, #tpu.memory_space<vmem>>, %arg7: memref<1x5xf32, #tpu.memory_space<vmem>>, %arg8: memref<32x5xf32, #tpu.memory_space<vmem>>) attributes {dimension_semantics = [#tpu.dimension_semantics<parallel>], iteration_bounds = array<i64: 2>, scalar_prefetch = 0 : i64, scratch_operands = 0 : i64, tpu.core_type = #tpu.core_type<tc>, window_params = [{transform_indices = @transform_0, window_bounds = array<i64: 32, 50>}, {pipeline_mode = #tpu.pipeline_mode<synchronous>, transform_indices = @transform_1, window_bounds = array<i64: 50, 20>}, {pipeline_mode = #tpu.pipeline_mode<synchronous>, transform_indices = @transform_2, window_bounds = array<i64: 1, 20>}, {pipeline_mode = #tpu.pipeline_mode<synchronous>, transform_indices = @transform_3, window_bounds = array<i64: 20, 20>}, {pipeline_mode = #tpu.pipeline_mode<synchronous>, transform_indices = @transform_4, window_bounds = array<i64: 1, 20>}, {pipeline_mode = #tpu.pipeline_mode<synchronous>, transform_indices = @transform_5, window_bounds = array<i64: 20, 5>}, {pipeline_mode = #tpu.pipeline_mode<synchronous>, transform_indices = @transform_6, window_bounds = array<i64: 1, 5>}, {transform_indices = @transform_7, window_bounds = array<i64: 32, 5>}]} {
    %c0 = arith.constant 0 : index
    %c0_0 = arith.constant 0 : index
    %0 = vector.load %arg1[%c0, %c0_0] : memref<32x50xf32, #tpu.memory_space<vmem>>, vector<32x50xf32>
    %1 = arith.truncf %0 : vector<32x50xf32> to vector<32x50xbf16>
    %c0_1 = arith.constant 0 : index
    %c0_2 = arith.constant 0 : index
    %2 = vector.load %arg2[%c0_1, %c0_2] : memref<50x20xbf16, #tpu.memory_space<vmem>>, vector<50x20xbf16>
    %cst = arith.constant dense<0.000000e+00> : vector<32x20xf32>
    %3 = tpu.matmul %1, %2, %cst {dimension_numbers = #tpu.dot_dimension_numbers<[1], [0], [0], [1], [0, 0, 1, 1], [], []>} : vector<32x50xbf16>, vector<50x20xbf16>, vector<32x20xf32> -> vector<32x20xf32>
    %c0_3 = arith.constant 0 : index
    %c0_4 = arith.constant 0 : index
    %4 = vector.load %arg3[%c0_3, %c0_4] : memref<1x20xf32, #tpu.memory_space<vmem>>, vector<1x20xf32>
    %5 = vector.broadcast %4 : vector<1x20xf32> to vector<32x20xf32>
    %6 = arith.addf %3, %5 : vector<32x20xf32>
    %cst_5 = arith.constant 0.000000e+00 : f32
    %7 = vector.broadcast %cst_5 : f32 to vector<32x20xf32>
    %8 = arith.maximumf %6, %7 : vector<32x20xf32>
    %9 = arith.truncf %8 : vector<32x20xf32> to vector<32x20xbf16>
    %c0_6 = arith.constant 0 : index
    %c0_7 = arith.constant 0 : index
    %10 = vector.load %arg4[%c0_6, %c0_7] : memref<20x20xbf16, #tpu.memory_space<vmem>>, vector<20x20xbf16>
    %cst_8 = arith.constant dense<0.000000e+00> : vector<32x20xf32>
    %11 = tpu.matmul %9, %10, %cst_8 {dimension_numbers = #tpu.dot_dimension_numbers<[1], [0], [0], [1], [0, 0, 1, 1], [], []>} : vector<32x20xbf16>, vector<20x20xbf16>, vector<32x20xf32> -> vector<32x20xf32>
    %c0_9 = arith.constant 0 : index
    %c0_10 = arith.constant 0 : index
    %12 = vector.load %arg5[%c0_9, %c0_10] : memref<1x20xf32, #tpu.memory_space<vmem>>, vector<1x20xf32>
    %13 = vector.broadcast %12 : vector<1x20xf32> to vector<32x20xf32>
    %14 = arith.addf %11, %13 : vector<32x20xf32>
    %cst_11 = arith.constant 0.000000e+00 : f32
    %15 = vector.broadcast %cst_11 : f32 to vector<32x20xf32>
    %16 = arith.maximumf %14, %15 : vector<32x20xf32>
    %17 = arith.truncf %16 : vector<32x20xf32> to vector<32x20xbf16>
    %c0_12 = arith.constant 0 : index
    %c0_13 = arith.constant 0 : index
    %18 = vector.load %arg6[%c0_12, %c0_13] : memref<20x5xbf16, #tpu.memory_space<vmem>>, vector<20x5xbf16>
    %cst_14 = arith.constant dense<0.000000e+00> : vector<32x5xf32>
    %19 = tpu.matmul %17, %18, %cst_14 {dimension_numbers = #tpu.dot_dimension_numbers<[1], [0], [0], [1], [0, 0, 1, 1], [], []>} : vector<32x20xbf16>, vector<20x5xbf16>, vector<32x5xf32> -> vector<32x5xf32>
    %c0_15 = arith.constant 0 : index
    %c0_16 = arith.constant 0 : index
    %20 = vector.load %arg7[%c0_15, %c0_16] : memref<1x5xf32, #tpu.memory_space<vmem>>, vector<1x5xf32>
    %21 = vector.broadcast %20 : vector<1x5xf32> to vector<32x5xf32>
    %22 = arith.addf %19, %21 : vector<32x5xf32>
    %c0_17 = arith.constant 0 : index
    %c0_18 = arith.constant 0 : index
    %23 = vector.load %arg8[%c0_17, %c0_18] : memref<32x5xf32, #tpu.memory_space<vmem>>, vector<32x5xf32>
    tpu.vector_store %arg8[%c0_17, %c0_18], %22 {strides = array<i32>} : memref<32x5xf32, #tpu.memory_space<vmem>>, vector<32x5xf32>,
    return
  }
  func.func @transform_0(%arg0: i32) -> (i32, i32) {
    %c0_i32 = arith.constant 0 : i32
    %c0_i32_0 = arith.constant 0 : i32
    return %arg0, %c0_i32 : i32, i32
  }
  func.func @transform_1(%arg0: i32) -> (i32, i32) {
    %c0_i32 = arith.constant 0 : i32
    %c0_i32_0 = arith.constant 0 : i32
    %c0_i32_1 = arith.constant 0 : i32
    return %c0_i32, %c0_i32_0 : i32, i32
  }
  func.func @transform_2(%arg0: i32) -> (i32, i32) {
    %c0_i32 = arith.constant 0 : i32
    %c0_i32_0 = arith.constant 0 : i32
    %c0_i32_1 = arith.constant 0 : i32
    return %c0_i32, %c0_i32_0 : i32, i32
  }
  func.func @transform_3(%arg0: i32) -> (i32, i32) {
    %c0_i32 = arith.constant 0 : i32
    %c0_i32_0 = arith.constant 0 : i32
    %c0_i32_1 = arith.constant 0 : i32
    return %c0_i32, %c0_i32_0 : i32, i32
  }
  func.func @transform_4(%arg0: i32) -> (i32, i32) {
    %c0_i32 = arith.constant 0 : i32
    %c0_i32_0 = arith.constant 0 : i32
    %c0_i32_1 = arith.constant 0 : i32
    return %c0_i32, %c0_i32_0 : i32, i32
  }
  func.func @transform_5(%arg0: i32) -> (i32, i32) {
    %c0_i32 = arith.constant 0 : i32
    %c0_i32_0 = arith.constant 0 : i32
    %c0_i32_1 = arith.constant 0 : i32
    return %c0_i32, %c0_i32_0 : i32, i32
  }
  func.func @transform_6(%arg0: i32) -> (i32, i32) {
    %c0_i32 = arith.constant 0 : i32
    %c0_i32_0 = arith.constant 0 : i32
    %c0_i32_1 = arith.constant 0 : i32
    return %c0_i32, %c0_i32_0 : i32, i32
  }
  func.func @transform_7(%arg0: i32) -> (i32, i32) {
    %c0_i32 = arith.constant 0 : i32
    %c0_i32_0 = arith.constant 0 : i32
    return %arg0, %c0_i32 : i32, i32
  }
}

</mosaic_0001>

<bundles_post_ra>
// kernel: price_generator_forward.1
= control target key start
LH: loop header
LB: loop body
LE: loop exit
PB: predicated region body
PF: predicated region fallthrough
CT: control target
= control target key end

     0   :  { %s750_s24 = smov 0   ;;  %s815_s0 = inlined_call_operand.vmem [shape: f32[64,50], index: 0, kind: input, shape index: {}]   ;;  %s816_s1 = inlined_call_operand.vmem [shape: bf16[50,20], index: 1, kind: input, shape index: {}]   ;;  %s817_s2 = inlined_call_operand.vmem [shape: f32[1,20], index: 2, kind: input, shape index: {}]   ;;  %s818_s3 = inlined_call_operand.vmem [shape: bf16[20,20], index: 3, kind: input, shape index: {}]   ;;  %s819_s4 = inlined_call_operand.vmem [shape: f32[1,20], index: 4, kind: input, shape index: {}]   ;;  %s820_s5 = inlined_call_operand.vmem [shape: bf16[20,5], index: 5, kind: input, shape index: {}]   ;;  %s821_s6 = inlined_call_operand.vmem [shape: f32[1,5], index: 6, kind: input, shape index: {}]   ;;  %s822_s7 = inlined_call_operand.vmem [shape: f32[64,5], index: 7, kind: output, shape index: {}]  }
   0x1 LB: > { %s613_s25 = sadd.s32 4294967295, %s708_s24   ;;  %p617_p0 = scmp.ge.s32.totalorder %s708_s24, 1  ;;  %s708_s24 = sphi %s750_s24, %s17_s24  }
   0x2   : > { %p238_p1 = scmp.lt.s32.totalorder %s708_s24, 3 }
   0x4   : > { %p239_p2 = pnand %p617_p0, %p238_p1 }
   0x5   : > { %s618_s30 = sshll.u32 (!%p239_p2), %s613_s25, 2 }
   0x6   : > { %242 = sbr.rel (%p239_p2) target bundleno = 642 (0x282), region = 48  ;;  %p271_p3 = scmp.lt.s32.totalorder (!%p239_p2), %s618_s30, 7 }
   0xb   : > { %v694_v0 = vld [vmem:[%s816_s1 + $0x18] ss:$0 sps:$4 sm:$0x11]   ;;  %vm331_vm0 = vcmask 1040384   ;;  %v695_v1 = vld [vmem:[%s816_s1 + $0x10] sm:$0xff]   ;;  %v696_v3 = vld [vmem:[%s816_s1 + $0x8] sm:$0xff]  }
   0xc   : > { %683 = vmatprep.subr.msk.bf16.mxu0 %vm331_vm0, %v694_v0  ;;  %v333_v2 = vsel %vm331_vm0, %v694_v0, 0  ;;  %s824_s30 = smov (!%p271_p3, %s618_s30), 7  ;;  %v697_v4 = vld [vmem:[%s816_s1] sm:$0xff]   ;;  %vm324_vm1 = vcmask 408576   ;;  %vm416_vm2 = vcmask 1041408   ;;  %vm409_vm3 = vcmask 162816  }
   0xd   : > { %656 = vmatpush3.bf16.msra.mxu0 %v333_v2  ;;  %s619_s10 = sshll.u32 %s824_s30, 3  ;;  %v698_v11 = vld [vmem:[%s818_s3 + $0x8] ss:$0 sps:$4 sm:$0x33]   ;;  %v699_v13 = vld [vmem:[%s818_s3] sm:$0xff]   ;;  %vm552_vm4 = vcmask 39936  }
   0xe   : > { %657 = vmatprep.subr.bf16.mxu0 %v695_v1  ;;  %s274_s15 = scalar_lea.vmem %s815_s0, %s619_s10  ;;  %684 = vmatprep.subr.msk.bf16.mxu1 %vm416_vm2, %v698_v11  ;;  %v418_v12 = vsel %vm416_vm2, %v698_v11, 0  ;;  %v622_v16 = vld [vmem:[%s817_s2] ss:$0 sm:$0xff]  ;;  %v700_v29 = vld [vmem:[%s820_s5 + $0x8] ss:$0 sps:$4 sm:$0x33]   ;;  %s280_s9 = scalar_lea.vmem %s822_s7, %s619_s10 }
   0xf   : > { %v283_v5 = vld [vmem:[%s274_s15] sm:$0xff]  ;;  %v284_v6 = vld [vmem:[%s274_s15 + $0x8] sm:$0xff]  ;;  %v285_v8 = vld [vmem:[%s274_s15 + $0x10] sm:$0xff]  ;;  %668 = vmatpush3.bf16.msra.mxu1 %v418_v12  ;;  %v501_v30 = vsel %vm416_vm2, %v700_v29, 0 }
  0x10   : > { %v287_v7 = vpack.c.bf16 %v284_v6, %v283_v5  ;;  %v286_v9 = vld [vmem:[%s274_s15 + $0x18] sm:$0xff]  ;;  %669 = vmatprep.subr.bf16.mxu1 %v699_v13  ;;  %v701_v31 = vld [vmem:[%s820_s5] sm:$0xff]  }
  0x11   : > { %658 = vmatpush3.bf16.msra.mxu0 %v695_v1  ;;  %v288_v10 = vpack.c.bf16 %v286_v9, %v285_v8  ;;  %v629_v34 = vld [vmem:[%s819_s4] ss:$0 sm:$0xff] }
  0x12   : > { %659 = vmatprep.subr.bf16.mxu0 %v696_v3  ;;  %663 = vmatprep.mubr.msk.bf16.mxu0 %vm324_vm1, %v287_v7  ;;  %v634_v48 = vld [vmem:[%s821_s6] ss:$0 sm:$0xff] }
  0x13   : > { %670 = vmatpush3.bf16.msra.mxu1 %v699_v13 }
  0x14   : > { %685 = vmatprep.subr.msk.bf16.mxu1 %vm416_vm2, %v700_v29 }
  0x15   : > { %660 = vmatpush3.bf16.msra.mxu0 %v696_v3 }
  0x16   : > { %661 = vmatprep.subr.bf16.mxu0 %v697_v4 }
  0x19   : > { %662 = vmatpush3.bf16.msra.mxu0 %v697_v4 }
  0x1c   : > { %664 = vmatmul.mubr.msk.bf16.vlgmr.msra.gmra.mxu0 %vm324_vm1, %v288_v10 }
  0xdc   : > { %v665_v14 = vpop.f32.mrf.mxu0 }
  0xdd   : > { %v378_v20 = vadd.f32 %v665_v14, %v622_v16 }
  0xde   : > { %v369_v15 = vpop.f32.mrf.mxu0 }
  0xdf   : > { %v370_v18 = vadd.f32 %v622_v16, %v369_v15  ;;  %v386_v26 = vmax.f32 %v378_v20, 0.0 }
  0xe0   : > { %v666_v17 = vpop.f32.mrf.mxu0 }
  0xe1   : > { %v381_v19 = vadd.f32 %v666_v17, %v622_v16  ;;  %v384_v24 = vmax.f32 %v370_v18, 0.0 }
  0xe2   : > { %v372_v21 = vpop.f32.mrf.mxu0 }
  0xe3   : > { %v373_v22 = vadd.f32 %v622_v16, %v372_v21  ;;  %v387_v23 = vmax.f32 %v381_v19, 0.0 }
  0xe5   : > { %v385_v25 = vmax.f32 %v373_v22, 0.0  ;;  %v389_v28 = vpack.c.bf16 %v387_v23, %v386_v26 }
  0xe7   : > { %v388_v27 = vpack.c.bf16 %v385_v25, %v384_v24 }
  0xe9   : > { %671 = vmatprep.mubr.msk.bf16.mxu1 %vm409_vm3, %v388_v27 }
  0xea   : > { %672 = vmatmul.mubr.msk.bf16.vlgmr.msra.gmra.mxu1 %vm409_vm3, %v389_v28 }
  0xeb   : > { %676 = vmatpush3.bf16.msra.mxu1 %v501_v30 }
  0xec   : > { %677 = vmatprep.subr.bf16.mxu1 %v701_v31 }
  0xef   : > { %678 = vmatpush3.bf16.msra.mxu1 %v701_v31 }
 0x1aa   : > { %v673_v32 = vpop.f32.mrf.mxu1 }
 0x1ab   : > { %v463_v38 = vadd.f32 %v673_v32, %v629_v34 }
 0x1ac   : > { %v454_v33 = vpop.f32.mrf.mxu1 }
 0x1ad   : > { %v455_v36 = vadd.f32 %v629_v34, %v454_v33  ;;  %v471_v44 = vmax.f32 %v463_v38, 0.0 }
 0x1ae   : > { %v674_v35 = vpop.f32.mrf.mxu1 }
 0x1af   : > { %v466_v37 = vadd.f32 %v674_v35, %v629_v34  ;;  %v469_v42 = vmax.f32 %v455_v36, 0.0 }
 0x1b0   : > { %v457_v39 = vpop.f32.mrf.mxu1 }
 0x1b1   : > { %v458_v40 = vadd.f32 %v629_v34, %v457_v39  ;;  %v472_v41 = vmax.f32 %v466_v37, 0.0 }
 0x1b3   : > { %v470_v43 = vmax.f32 %v458_v40, 0.0  ;;  %v474_v46 = vpack.c.bf16 %v472_v41, %v471_v44 }
 0x1b5   : > { %v473_v45 = vpack.c.bf16 %v470_v43, %v469_v42 }
 0x1b7   : > { %679 = vmatprep.mubr.msk.bf16.mxu1 %vm409_vm3, %v473_v45 }
 0x1b8   : > { %680 = vmatmul.mubr.msk.bf16.vlgmr.msra.gmra.mxu1 %vm409_vm3, %v474_v46 }
 0x278   : > { %v681_v47 = vpop.f32.mrf.mxu1 }
 0x279   : > { %v546_v54 = vadd.f32 %v681_v47, %v634_v48 }
 0x27a   : > { %v537_v49 = vpop.f32.mrf.mxu1 }
 0x27b   : > { %v538_v50 = vadd.f32 %v634_v48, %v537_v49  ;;  %555 = vst.msk [vmem:[%s280_s9 + $0x10] sm:$0xff] %vm552_vm4, %v546_v54 }
 0x27c   : > { %v682_v51 = vpop.f32.mrf.mxu1 }
 0x27d   : > { %553 = vst.msk [vmem:[%s280_s9] sm:$0xff] %vm552_vm4, %v538_v50  ;;  %v549_v55 = vadd.f32 %v682_v51, %v634_v48 }
 0x27e   : > { %v540_v52 = vpop.f32.mrf.mxu1 }
 0x27f   : > { %v541_v53 = vadd.f32 %v634_v48, %v540_v52  ;;  %556 = vst.msk [vmem:[%s280_s9 + $0x18] sm:$0xff] %vm552_vm4, %v549_v55 }
 0x281   : > { %554 = vst.msk [vmem:[%s280_s9 + $0x8] sm:$0xff] %vm552_vm4, %v541_v53 }
 0x282 PF: > { %s17_s24 = sadd.s32 1, %s708_s24  }
 0x283   : > { %p14_p4 = scmp.ge.s32.totalorder %s17_s24, 4  }
 0x285   :  { %16 = sbr.rel (!%p14_p4) target bundleno = 1 (0x1), region = 78 }

</bundles_post_ra>
